<compile_context>
chip_gen: v7x
topology: tpu7x:2x2x1
jax: 0.10.0
libtpu: 0.0.40
codegen_flags: <defaults>
</compile_context>

<pallas_src>
import functools

import jax
import jax.numpy as jnp
from jax.experimental import pallas as pl
from jax.experimental.pallas import tpu as pltpu


def _round_up(x, m):
    return (x + m - 1) // m * m


def _lineconv_kernel(layers, vchunk, idx_ref, emb_ref, d_ref, a_ref,
                     invlen_ref, o_ref):
    """Full LineConv forward for one (padded) batch of sessions.

    idx_ref    : (Bp, S)   int32   item ids (0 = padding -> zero embedding row)
    emb_ref    : (Vp, Ep)  float32 item table, zero row 0, zero-padded
    d_ref      : (Bp, Bp)  float32
    a_ref      : (Bp, Bp)  float32
    invlen_ref : (1,  Bp)  float32 1/session_len as a row vector (1.0 in pads)
    o_ref      : (Bp, Ep)  float32 output
    """
    Bp, S = idx_ref.shape
    Vp, Ep = emb_ref.shape

    # --- M = (1/(layers+1)) * (I + DA + DA^2 + ... + DA^layers) ---------------
    # All in tiny (Bp,Bp) space; the per-session 1/len is folded into M's
    # columns so no (Bp,Ep)-wide divide is ever needed.
    da = jnp.dot(d_ref[...], a_ref[...], preferred_element_type=jnp.float32)
    eye = (jax.lax.broadcasted_iota(jnp.int32, (Bp, Bp), 0)
           == jax.lax.broadcasted_iota(jnp.int32, (Bp, Bp), 1)
           ).astype(jnp.float32)
    if layers >= 1:
        p = da
        m = eye + da
        for _ in range(layers - 1):                      # static unroll, tiny
            p = jnp.dot(da, p, preferred_element_type=jnp.float32)
            m = m + p
    else:
        m = eye
    # Columns scaled by 1/len[j]; mean over (layers+1) states folded in too.
    m = m * (invlen_ref[...] * (1.0 / float(layers + 1)))   # (1,Bp) bcast

    # --- gather + sum-pool as one-hot-counts @ table, chunked over vocab ------
    # counts[b, v] = #{ t : session_item[b, t] == v }; repeated indices become
    # integer counts, padding index 0 hits the zero row -> exact.
    idx = idx_ref[...]                                       # (Bp, S) int32
    pooled = jnp.zeros((Bp, Ep), jnp.float32)
    for c0 in range(0, Vp, vchunk):                          # static chunk loop
        vt = min(vchunk, Vp - c0)                            # multiple of 128
        iota_v = jax.lax.broadcasted_iota(jnp.int32, (Bp, vt), 1) + c0
        counts = jnp.zeros((Bp, vt), jnp.float32)
        for t in range(S):                                   # S is static
            counts = counts + (iota_v == idx[:, t:t + 1]).astype(jnp.float32)
        # bf16 cast of counts / emb (f32 accumulation) is the v6e/v7x lever if
        # the table grows; kept f32 here to stay within 1e-3 of the reference.
        pooled = pooled + jnp.dot(counts, emb_ref[c0:c0 + vt, :],
                                  preferred_element_type=jnp.float32)

    # --- single Ep-wide matmul for the final output ---------------------------
    o_ref[...] = jnp.dot(m, pooled,
                         preferred_element_type=jnp.float32).astype(o_ref.dtype)


def prepare_item_table(item_embedding):
    """One-time prep: prepend zero padding row, cast to f32, zero-pad to
    (Vp, Ep) with Vp, Ep multiples of 128. Returns (emb_padded, emb_size)."""
    n_items, E = item_embedding.shape
    V = n_items + 1
    Vp = _round_up(V, 128)        # lane dim of counts / K dim of gather matmul
    Ep = _round_up(E, 128)        # lane dim of pooled / output
    emb_p = jnp.zeros((Vp, Ep), jnp.float32)
    emb_p = emb_p.at[1:V, :E].set(item_embedding.astype(jnp.float32))
    return emb_p, E


@functools.partial(jax.jit, static_argnames=("layers", "emb_size", "vchunk"))
def lineconv_from_table(emb_p, D, A, session_item, session_len, *,
                        layers, emb_size, vchunk=512):
    """emb_p: pre-padded (Vp, Ep) table from prepare_item_table.
    D, A: (B, B); session_item: (B, S) int; session_len: (B, 1) float.
    Returns (B, emb_size)."""
    B, S = session_item.shape
    Vp, Ep = emb_p.shape
    Bp = _round_up(B, 8)
    vchunk = min(vchunk, Vp)

    # Per-call padding only for the small, changing inputs.
    idx_p = jnp.pad(session_item.astype(jnp.int32), ((0, Bp - B), (0, 0)))
    d_p = jnp.pad(D.astype(jnp.float32), ((0, Bp - B), (0, Bp - B)))
    a_p = jnp.pad(A.astype(jnp.float32), ((0, Bp - B), (0, Bp - B)))
    inv_len = 1.0 / session_len.astype(jnp.float32).reshape(1, B)
    invlen_p = jnp.pad(inv_len, ((0, 0), (0, Bp - B)), constant_values=1.0)

    # Advisory cost for XLA's scheduler around the custom call.
    flops = (2 * Bp * Vp * Ep            # one-hot gather matmul
             + 2 * (layers + 1) * Bp * Bp * Bp  # DA + its powers
             + 2 * Bp * Bp * Ep)         # final M' @ pooled
    bytes_accessed = 4 * (Vp * Ep + Bp * S + 2 * Bp * Bp + Bp + Bp * Ep)
    cost = pl.CostEstimate(flops=flops, transcendentals=0,
                           bytes_accessed=bytes_accessed)

    # VMEM budget: inputs + output + in-kernel temporaries (counts, pooled,
    # DA/M), with 2x headroom; capped at the v7x 64 MiB physical limit.
    live_bytes = (bytes_accessed
                  + 4 * (Bp * vchunk + Bp * Ep + 2 * Bp * Bp))
    vmem_limit = int(min(64 * 1024 * 1024,
                         max(16 * 1024 * 1024, 2 * live_bytes)))

    kernel = functools.partial(_lineconv_kernel, int(layers), int(vchunk))
    vmem = pl.BlockSpec(memory_space=pltpu.MemorySpace.VMEM)
    out = pl.pallas_call(
        kernel,
        out_shape=jax.ShapeDtypeStruct((Bp, Ep), jnp.float32),
        in_specs=[vmem, vmem, vmem, vmem, vmem],
        out_specs=vmem,
        compiler_params=pltpu.CompilerParams(vmem_limit_bytes=vmem_limit),
        cost_estimate=cost,
    )(idx_p, emb_p, d_p, a_p, invlen_p)

    return out[:B, :emb_size]


class LineConvPallas:
    """Mirrors LineConv.forward; caches the padded embedding table so the
    (V, E) copy/pad happens once, not per call."""

    def __init__(self, layers, emb_size=100):
        self.layers = layers
        self.emb_size = emb_size
        self._table_src = None
        self._emb_p = None

    def prepare(self, item_embedding):
        self._emb_p, e = prepare_item_table(item_embedding)
        assert e == self.emb_size
        self._table_src = item_embedding
        return self

    def __call__(self, item_embedding, D, A, session_item, session_len):
        if self._emb_p is None or self._table_src is not item_embedding:
            self.prepare(item_embedding)
        return lineconv_from_table(self._emb_p, D, A, session_item,
                                   session_len, layers=self.layers,
                                   emb_size=self.emb_size)


def _reference(item_embedding, D, A, session_item, session_len, layers):
    """Pure-JAX mirror of the PyTorch LineConv.forward."""
    E = item_embedding.shape[1]
    emb = jnp.concatenate([jnp.zeros((1, E), jnp.float32),
                           item_embedding.astype(jnp.float32)], axis=0)
    seq_h = emb[session_item]                          # (B, S, E) gather
    x = seq_h.sum(axis=1) / session_len                # (B, E)
    session = [x]
    DA = D.astype(jnp.float32) @ A.astype(jnp.float32)
    for _ in range(layers):
        x = DA @ x
        session.append(x)
    return jnp.mean(jnp.stack(session, axis=0), axis=0)


if __name__ == "__main__":
    E = 100        # emb_size (module default)
    n_items = 37
    B = 6          # number of sessions (D / A are (B, B))
    S = 8          # max session length
    layers = 3

    key = jax.random.PRNGKey(0)
    k1, k2, k3, k4, k5 = jax.random.split(key, 5)

    item_embedding = jax.random.normal(k1, (n_items, E), jnp.float32)

    lengths = jax.random.randint(k2, (B,), 3, S + 1)
    raw = jax.random.randint(k3, (B, S), 1, n_items + 1)
    pos = jnp.arange(S)[None, :]
    session_item = jnp.where(pos < lengths[:, None], raw, 0).astype(jnp.int32)
    session_len = lengths.astype(jnp.float32)[:, None]           # (B, 1)

    # D (degree normalisation) and A (session adjacency); scaled so the
    # propagation stays O(1) numerically, as in the real normalised graph.
    D = jax.random.uniform(k4, (B, B), jnp.float32) / B
    A = jax.random.uniform(k5, (B, B), jnp.float32)

    model = LineConvPallas(layers=layers, emb_size=E)
    model.prepare(item_embedding)            # one-time table prep (hoisted)
    out = model(item_embedding, D, A, session_item, session_len)
    out = jax.block_until_ready(out)

    ref = _reference(item_embedding, D, A, session_item, session_len, layers)
    assert out.shape == (B, E)
    assert jnp.allclose(out, ref, atol=1e-3, rtol=1e-3), \
        float(jnp.max(jnp.abs(out - ref)))

    print("KERNEL_OK")
</pallas_src>

<mosaic_0001>
module attributes {stable_mosaic.version = 11 : i64} {
  func.func @_lineconv_kernel(%arg0: memref<8x8xi32, #tpu.memory_space<vmem>>, %arg1: memref<128x128xf32, #tpu.memory_space<vmem>>, %arg2: memref<8x8xf32, #tpu.memory_space<vmem>>, %arg3: memref<8x8xf32, #tpu.memory_space<vmem>>, %arg4: memref<1x8xf32, #tpu.memory_space<vmem>>, %arg5: memref<8x128xf32, #tpu.memory_space<vmem>>) attributes {dimension_semantics = [], scalar_prefetch = 0 : i64, scratch_operands = 0 : i64, tpu.core_type = #tpu.core_type<tc>} {
    %c0 = arith.constant 0 : index
    %c0_0 = arith.constant 0 : index
    %0 = vector.load %arg2[%c0, %c0_0] : memref<8x8xf32, #tpu.memory_space<vmem>>, vector<8x8xf32>
    %c0_1 = arith.constant 0 : index
    %c0_2 = arith.constant 0 : index
    %1 = vector.load %arg3[%c0_1, %c0_2] : memref<8x8xf32, #tpu.memory_space<vmem>>, vector<8x8xf32>
    %cst = arith.constant dense<0.000000e+00> : vector<8x8xf32>
    %2 = tpu.matmul %0, %1, %cst {dimension_numbers = #tpu.dot_dimension_numbers<[1], [0], [0], [1], [0, 0, 1, 1], [], []>} : vector<8x8xf32>, vector<8x8xf32>, vector<8x8xf32> -> vector<8x8xf32>
    %3 = tpu.iota {dimensions = array<i32: 0>} : vector<8x8xi32>
    %4 = tpu.iota {dimensions = array<i32: 1>} : vector<8x8xi32>
    %5 = arith.cmpi eq, %3, %4 : vector<8x8xi32>
    %6 = arith.extui %5 : vector<8x8xi1> to vector<8x8xi32>
    %7 = arith.sitofp %6 : vector<8x8xi32> to vector<8x8xf32>
    %8 = arith.addf %7, %2 : vector<8x8xf32>
    %cst_3 = arith.constant dense<0.000000e+00> : vector<8x8xf32>
    %9 = tpu.matmul %2, %2, %cst_3 {dimension_numbers = #tpu.dot_dimension_numbers<[1], [0], [0], [1], [0, 0, 1, 1], [], []>} : vector<8x8xf32>, vector<8x8xf32>, vector<8x8xf32> -> vector<8x8xf32>
    %10 = arith.addf %8, %9 : vector<8x8xf32>
    %cst_4 = arith.constant dense<0.000000e+00> : vector<8x8xf32>
    %11 = tpu.matmul %2, %9, %cst_4 {dimension_numbers = #tpu.dot_dimension_numbers<[1], [0], [0], [1], [0, 0, 1, 1], [], []>} : vector<8x8xf32>, vector<8x8xf32>, vector<8x8xf32> -> vector<8x8xf32>
    %12 = arith.addf %10, %11 : vector<8x8xf32>
    %c0_5 = arith.constant 0 : index
    %c0_6 = arith.constant 0 : index
    %13 = vector.load %arg4[%c0_5, %c0_6] : memref<1x8xf32, #tpu.memory_space<vmem>>, vector<1x8xf32>
    %cst_7 = arith.constant 2.500000e-01 : f32
    %14 = vector.broadcast %cst_7 : f32 to vector<1x8xf32>
    %15 = arith.mulf %13, %14 : vector<1x8xf32>
    %16 = vector.broadcast %15 : vector<1x8xf32> to vector<8x8xf32>
    %17 = arith.mulf %12, %16 : vector<8x8xf32>
    %c0_8 = arith.constant 0 : index
    %c0_9 = arith.constant 0 : index
    %18 = vector.load %arg0[%c0_8, %c0_9] : memref<8x8xi32, #tpu.memory_space<vmem>>, vector<8x8xi32>
    %cst_10 = arith.constant 0.000000e+00 : f32
    %19 = vector.broadcast %cst_10 : f32 to vector<8x128xf32>
    %20 = tpu.iota {dimensions = array<i32: 1>} : vector<8x128xi32>
    %c0_i32 = arith.constant 0 : i32
    %21 = vector.broadcast %c0_i32 : i32 to vector<8x128xi32>
    %22 = arith.addi %20, %21 : vector<8x128xi32>
    %cst_11 = arith.constant 0.000000e+00 : f32
    %23 = vector.broadcast %cst_11 : f32 to vector<8x128xf32>
    %24 = vector.extract_strided_slice %18 {offsets = [0, 0], sizes = [8, 1], strides = [1, 1]} : vector<8x8xi32> to vector<8x1xi32>
    %25 = vector.broadcast %24 : vector<8x1xi32> to vector<8x128xi32>
    %26 = arith.cmpi eq, %22, %25 : vector<8x128xi32>
    %27 = arith.extui %26 : vector<8x128xi1> to vector<8x128xi32>
    %28 = arith.sitofp %27 : vector<8x128xi32> to vector<8x128xf32>
    %29 = arith.addf %23, %28 : vector<8x128xf32>
    %30 = vector.extract_strided_slice %18 {offsets = [0, 1], sizes = [8, 1], strides = [1, 1]} : vector<8x8xi32> to vector<8x1xi32>
    %31 = vector.broadcast %30 : vector<8x1xi32> to vector<8x128xi32>
    %32 = arith.cmpi eq, %22, %31 : vector<8x128xi32>
    %33 = arith.extui %32 : vector<8x128xi1> to vector<8x128xi32>
    %34 = arith.sitofp %33 : vector<8x128xi32> to vector<8x128xf32>
    %35 = arith.addf %29, %34 : vector<8x128xf32>
    %36 = vector.extract_strided_slice %18 {offsets = [0, 2], sizes = [8, 1], strides = [1, 1]} : vector<8x8xi32> to vector<8x1xi32>
    %37 = vector.broadcast %36 : vector<8x1xi32> to vector<8x128xi32>
    %38 = arith.cmpi eq, %22, %37 : vector<8x128xi32>
    %39 = arith.extui %38 : vector<8x128xi1> to vector<8x128xi32>
    %40 = arith.sitofp %39 : vector<8x128xi32> to vector<8x128xf32>
    %41 = arith.addf %35, %40 : vector<8x128xf32>
    %42 = vector.extract_strided_slice %18 {offsets = [0, 3], sizes = [8, 1], strides = [1, 1]} : vector<8x8xi32> to vector<8x1xi32>
    %43 = vector.broadcast %42 : vector<8x1xi32> to vector<8x128xi32>
    %44 = arith.cmpi eq, %22, %43 : vector<8x128xi32>
    %45 = arith.extui %44 : vector<8x128xi1> to vector<8x128xi32>
    %46 = arith.sitofp %45 : vector<8x128xi32> to vector<8x128xf32>
    %47 = arith.addf %41, %46 : vector<8x128xf32>
    %48 = vector.extract_strided_slice %18 {offsets = [0, 4], sizes = [8, 1], strides = [1, 1]} : vector<8x8xi32> to vector<8x1xi32>
    %49 = vector.broadcast %48 : vector<8x1xi32> to vector<8x128xi32>
    %50 = arith.cmpi eq, %22, %49 : vector<8x128xi32>
    %51 = arith.extui %50 : vector<8x128xi1> to vector<8x128xi32>
    %52 = arith.sitofp %51 : vector<8x128xi32> to vector<8x128xf32>
    %53 = arith.addf %47, %52 : vector<8x128xf32>
    %54 = vector.extract_strided_slice %18 {offsets = [0, 5], sizes = [8, 1], strides = [1, 1]} : vector<8x8xi32> to vector<8x1xi32>
    %55 = vector.broadcast %54 : vector<8x1xi32> to vector<8x128xi32>
    %56 = arith.cmpi eq, %22, %55 : vector<8x128xi32>
    %57 = arith.extui %56 : vector<8x128xi1> to vector<8x128xi32>
    %58 = arith.sitofp %57 : vector<8x128xi32> to vector<8x128xf32>
    %59 = arith.addf %53, %58 : vector<8x128xf32>
    %60 = vector.extract_strided_slice %18 {offsets = [0, 6], sizes = [8, 1], strides = [1, 1]} : vector<8x8xi32> to vector<8x1xi32>
    %61 = vector.broadcast %60 : vector<8x1xi32> to vector<8x128xi32>
    %62 = arith.cmpi eq, %22, %61 : vector<8x128xi32>
    %63 = arith.extui %62 : vector<8x128xi1> to vector<8x128xi32>
    %64 = arith.sitofp %63 : vector<8x128xi32> to vector<8x128xf32>
    %65 = arith.addf %59, %64 : vector<8x128xf32>
    %66 = vector.extract_strided_slice %18 {offsets = [0, 7], sizes = [8, 1], strides = [1, 1]} : vector<8x8xi32> to vector<8x1xi32>
    %67 = vector.broadcast %66 : vector<8x1xi32> to vector<8x128xi32>
    %68 = arith.cmpi eq, %22, %67 : vector<8x128xi32>
    %69 = arith.extui %68 : vector<8x128xi1> to vector<8x128xi32>
    %70 = arith.sitofp %69 : vector<8x128xi32> to vector<8x128xf32>
    %71 = arith.addf %65, %70 : vector<8x128xf32>
    %c0_12 = arith.constant 0 : index
    %c0_13 = arith.constant 0 : index
    %72 = vector.load %arg1[%c0_12, %c0_13] : memref<128x128xf32, #tpu.memory_space<vmem>>, vector<128x128xf32>
    %cst_14 = arith.constant dense<0.000000e+00> : vector<8x128xf32>
    %73 = tpu.matmul %71, %72, %cst_14 {dimension_numbers = #tpu.dot_dimension_numbers<[1], [0], [0], [1], [0, 0, 1, 1], [], []>} : vector<8x128xf32>, vector<128x128xf32>, vector<8x128xf32> -> vector<8x128xf32>
    %74 = arith.addf %19, %73 : vector<8x128xf32>
    %cst_15 = arith.constant dense<0.000000e+00> : vector<8x128xf32>
    %75 = tpu.matmul %17, %74, %cst_15 {dimension_numbers = #tpu.dot_dimension_numbers<[1], [0], [0], [1], [0, 0, 1, 1], [], []>} : vector<8x8xf32>, vector<8x128xf32>, vector<8x128xf32> -> vector<8x128xf32>
    %c0_16 = arith.constant 0 : index
    %c0_17 = arith.constant 0 : index
    %76 = vector.load %arg5[%c0_16, %c0_17] : memref<8x128xf32, #tpu.memory_space<vmem>>, vector<8x128xf32>
    tpu.vector_store %arg5[%c0_16, %c0_17], %75 {strides = array<i32>} : memref<8x128xf32, #tpu.memory_space<vmem>>, vector<8x128xf32>,
    return
  }
}

</mosaic_0001>

<bundles_post_ra>
// kernel: lineconv_from_table.1
= control target key start
LH: loop header
LB: loop body
LE: loop exit
PB: predicated region body
PF: predicated region fallthrough
CT: control target
= control target key end

     0   :  { %10 = vsyncpa [#allocation3], 0  ;;  %s802_s0 = inlined_call_operand.vmem [shape: s32[8,8], index: 0, kind: input, shape index: {}]   ;;  %s803_s1 = inlined_call_operand.hbm [shape: f32[128,128], index: 1, kind: input, shape index: {}]   ;;  %s804_s2 = inlined_call_operand.vmem [shape: f32[8,8], index: 2, kind: input, shape index: {}]   ;;  %s805_s3 = inlined_call_operand.vmem [shape: f32[8,8], index: 3, kind: input, shape index: {}]   ;;  %s806_s4 = inlined_call_operand.vmem [shape: f32[1,8], index: 4, kind: input, shape index: {}]   ;;  %s807_s5 = inlined_call_operand.hbm [shape: f32[8,128], index: 5, kind: output, shape index: {}]  }
   0x1   :  { %11 = vsyncpa [#allocation4], 0  ;;  %s694_s18 = smov [#allocation2]   ;;  %s646_s22 = scalar_lea.hbm %s803_s1, 2048 }
   0x2   :  { %s19_s19 = sshll.u32 %s694_s18, 4  ;;  %p647_p0 = scmp.ne.s32.totalorder %s803_s1, %s646_s22  ;;  %s20_s19 = int_to_ptr.vmem [resolvable:$true] %s19_s19 }
   0x3   :  { %p650_p1 = scmp.lt.u32.totalorder %s646_s22, %s803_s1 }
   0x5   :  { %p652_p2 = pnand %p650_p1, %p647_p0 }
   0x7   :  { %655 = shalt.err (!%p652_p2)
}
   0x8   :  { %s656_s27 = scalar_lea.vmem %s20_s19, 2048  ;;  %p661_p4 = scmp.lt.s32.totalorder %s20_s19, %s20_s19 }
   0x9   :  { %p657_p3 = scmp.ne.s32.totalorder %s20_s19, %s656_s27  ;;  %p662_p5 = scmp.lt.s32.totalorder %s656_s27, %s656_s27 }
   0xb   :  { %p663_p6 = por %p662_p5, %p661_p4 }
   0xd   :  { %p664_p7 = pnand %p663_p6, %p657_p3 }
   0xf   :  { %667 = shalt.err (!%p664_p7)
}
  0x10   :  { %s695_s28 = smov 128   ;;  %s696_s29 = smov 8  }
  0x11   :  { %25 = dma.hbm_to_vmem [thread:$0]  %s803_s1, 2048, %s20_s19, [#allocation3], %s695_s28, %s695_s28, %s696_s29  }
  0x12   :  { %690 = dma.done.wait [#allocation3], 2048  }
  0x13   :  { %691 = vsyncadd [#allocation3], 4294965248  ;;  %v697_v0 = vmov 0.0   ;;  %vm698_vm0 = vmmov 0   ;;  %vm37_vm1 = vcmask 64512   ;;  %v36_v1 = vld [vmem:[%s805_s3] sm:$0xff]  ;;  %v111_v37 = vlaneseq }
  0x14   :  { %543 = vmatprep.subr.mxu0 %v697_v0  ;;  %545 = vmatprep.mubr.msk.f32.mxu0 %vm698_vm0, %v697_v0  ;;  %v35_v2 = vld [vmem:[%s804_s2] sm:$0xff]  ;;  %v699_v5 = vmov 2   ;;  %v700_v6 = vmov 0   ;;  %v331_v7 = vld [vmem:[#allocation2 + $0x8] sm:$0xff]  ;;  %v332_v8 = vld [vmem:[#allocation2 + $0x10] sm:$0xff]  ;;  %v701_v11 = vmov 0.0|0.0  }
  0x15   :  { %590 = vmatprep.mubr.msk.f32.mxu1 %vm698_vm0, %v697_v0  ;;  %544 = vmatpush3.msra.mxu0 %v36_v1  ;;  %v273_v3 = vld [vmem:[%s802_s0] sm:$0xff]  ;;  %v333_v10 = vld [vmem:[#allocation2 + $0x18] sm:$0xff]  ;;  %v702_v13 = vmov 3   ;;  %v703_v14 = vmov 1   ;;  %v335_v16 = vld [vmem:[#allocation2 + $0x28] sm:$0xff]  ;;  %v704_v20 = vmov 4  }
  0x16   :  { %546 = vmatmul.mubr.msk.f32.vlgmr.msra.gmra.mrb[0].mxu0 %vm37_vm1, %v35_v2  ;;  %548 = vmatprep.subr.mxu0 %v697_v0  ;;  %v330_v4 = vld [vmem:[#allocation2] sm:$0xff]  ;;  %v602_v12 = vpack.c.bf16 %v333_v10, %v332_v8  ;;  %v336_v18 = vld [vmem:[#allocation2 + $0x30] sm:$0xff]  ;;  %v337_v19 = vld [vmem:[#allocation2 + $0x38] sm:$0xff]  ;;  %v705_v21 = vmov 5   ;;  %v706_v25 = vmov 6   ;;  %v707_v26 = vmov 7  }
  0x17   :  { %550 = vmatprep.mubr.msk.f32.mxu0 %vm698_vm0, %v697_v0  ;;  %639 = vset.pattern.permute.xlu1 %v699_v5  ;;  %v599_v9 = vpack.c.bf16 %v331_v7, %v330_v4  ;;  %v334_v15 = vld [vmem:[#allocation2 + $0x20] sm:$0xff]  ;;  %v608_v22 = vpack.c.bf16 %v337_v19, %v336_v18  ;;  %v339_v24 = vld [vmem:[#allocation2 + $0x48] sm:$0xff]  ;;  %v340_v28 = vld [vmem:[#allocation2 + $0x50] sm:$0xff]  ;;  %v114_v38 = vand.u32 127, %v111_v37  ;;  %v112_v39 = vshrl.u32 %v111_v37, 7  ;;  %s708_s3 = smov [#allocation5]  }
  0x18   :  { %637 = vset.pattern.permute.xlu0 %v700_v6  ;;  %289 = vperm.xlu1 %639, %v273_v3   ;;  %v605_v17 = vpack.c.bf16 %v335_v16, %v334_v15  ;;  %v338_v23 = vld [vmem:[#allocation2 + $0x40] sm:$0xff]  ;;  %v341_v29 = vld [vmem:[#allocation2 + $0x58] sm:$0xff]  ;;  %v343_v32 = vld [vmem:[#allocation2 + $0x68] sm:$0xff]  ;;  %s496_s12 = sshll.u32 %s708_s3, 4  ;;  %s497_s12 = int_to_ptr.vmem [resolvable:$true] %s496_s12 }
  0x19   :  { %275 = vperm.xlu0 %637, %v273_v3   ;;  %598 = vmatprep.subr.bf16.mxu1 %v701_v11  ;;  %v611_v27 = vpack.c.bf16 %v339_v24, %v338_v23  ;;  %v614_v30 = vpack.c.bf16 %v341_v29, %v340_v28  ;;  %v342_v31 = vld [vmem:[#allocation2 + $0x60] sm:$0xff]  ;;  %v344_v34 = vld [vmem:[#allocation2 + $0x70] sm:$0xff]  ;;  %v345_v35 = vld [vmem:[#allocation2 + $0x78] sm:$0xff]  ;;  %vm115_vm2 = vcmp.eq.s32.totalorder %v112_v39, %v114_v38  ;;  %s668_s13 = scalar_lea.vmem %s497_s12, 128  ;;  %p673_p9 = scmp.lt.s32.totalorder %s497_s12, %s497_s12 }
  0x1a   :  { %600 = vmatpush3.bf16.msra.mxu1 %v599_v9  ;;  %v617_v33 = vpack.c.bf16 %v343_v32, %v342_v31  ;;  %v620_v36 = vpack.c.bf16 %v345_v35, %v344_v34  ;;  %v506_v40 = vsel %vm115_vm2, 1.0, %v697_v0  ;;  %v264_v9 = vld [vmem:[%s806_s4] sm:$0x1]  ;;  %p669_p8 = scmp.ne.s32.totalorder %s497_s12, %s668_s13  ;;  %p674_p10 = scmp.lt.s32.totalorder %s668_s13, %s668_s13 }
  0x1b   :  { %601 = vmatprep.subr.bf16.mxu1 %v701_v11  ;;  %v265_v10 = vmul.f32 0.25, %v264_v9 }
  0x1c   :  { %640 = vset.pattern.permute.xlu1 %v702_v13  ;;  %p675_p11 = por %p674_p10, %p673_p9 }
  0x1d   :  { %638 = vset.pattern.permute.xlu0 %v703_v14  ;;  %296 = vperm.xlu1 %640, %v273_v3  }
  0x1e   :  { %282 = vperm.xlu0 %638, %v273_v3   ;;  %603 = vmatpush3.bf16.msra.mxu1 %v602_v12  ;;  %p676_p12 = pnand %p675_p11, %p669_p8 }
  0x1f   :  { %604 = vmatprep.subr.bf16.mxu1 %v701_v11 }
  0x21   :  { %641 = vset.pattern.permute.xlu1 %v704_v20 }
  0x22   :  { %642 = vset.pattern.permute.xlu0 %v705_v21  ;;  %303 = vperm.xlu1 %641, %v273_v3  }
  0x23   :  { %310 = vperm.xlu0 %642, %v273_v3   ;;  %606 = vmatpush3.bf16.msra.mxu1 %v605_v17 }
  0x24   :  { %607 = vmatprep.subr.bf16.mxu1 %v701_v11 }
  0x26   :  { %643 = vset.pattern.permute.xlu1 %v706_v25 }
  0x27   :  { %645 = vset.pattern.permute.xlu0 %v707_v26  ;;  %317 = vperm.xlu1 %643, %v273_v3  }
  0x28   :  { %609 = vmatpush3.bf16.msra.mxu1 %v608_v22 }
  0x29   :  { %610 = vmatprep.subr.bf16.mxu1 %v701_v11 }
  0x2b   :  { %644 = vset.pattern.permute.xlu1 %v707_v26 }
  0x2c   :  { %612 = vmatpush3.bf16.msra.mxu1 %v611_v27  ;;  %324 = vperm.xlu1 %644, %v273_v3  }
  0x2d   :  { %613 = vmatprep.subr.bf16.mxu1 %v701_v11 }
  0x30   :  { %615 = vmatpush3.bf16.msra.mxu1 %v614_v30 }
  0x31   :  { %616 = vmatprep.subr.bf16.mxu1 %v701_v11 }
  0x34   :  { %618 = vmatpush3.bf16.msra.mxu1 %v617_v33 }
  0x35   :  { %619 = vmatprep.subr.bf16.mxu1 %v701_v11  ;;  %v269_v11 = vsub.s32 0, %v112_v39 }
  0x37   :  { %v270_v12 = vrot.slane %v265_v10, %v269_v11 }
  0x38   :  { %621 = vmatpush3.bf16.msra.mxu1 %v620_v36 }
  0x97   :  { %v290_v44 = vpop.permute.xlu1 %289 }
  0x98   :  { %v276_v45 = vpop.permute.xlu0 %275  ;;  %vm291_vm4 = vcmp.eq.s32.totalorder %v114_v38, %v290_v44 }
  0x99   :  { %vm277_vm3 = vcmp.eq.s32.totalorder %v114_v38, %v276_v45  ;;  %v511_v49 = vsel %vm291_vm4, 1.0, %v697_v0 }
  0x9a   :  { %v509_v46 = vsel %vm277_vm3, 1.0, %v697_v0 }
  0x9c   :  { %v297_v47 = vpop.permute.xlu1 %296 }
  0x9d   :  { %v283_v48 = vpop.permute.xlu0 %282  ;;  %vm298_vm5 = vcmp.eq.s32.totalorder %v114_v38, %v297_v47 }
  0x9e   :  { %vm284_vm6 = vcmp.eq.s32.totalorder %v114_v38, %v283_v48  ;;  %v512_v52 = vsel %vm298_vm5, 1.0, %v697_v0 }
  0x9f   :  { %v510_v50 = vsel %vm284_vm6, 1.0, %v697_v0 }
  0xa0   :  { %v287_v51 = vadd.f32 %v510_v50, %v509_v46 }
  0xa1   :  { %v304_v54 = vpop.permute.xlu1 %303 }
  0xa2   :  { %v294_v53 = vadd.f32 %v511_v49, %v287_v51  ;;  %v311_v55 = vpop.permute.xlu0 %310  ;;  %vm305_vm7 = vcmp.eq.s32.totalorder %v114_v38, %v304_v54 }
  0xa3   :  { %vm312_vm8 = vcmp.eq.s32.totalorder %v114_v38, %v311_v55  ;;  %v513_v57 = vsel %vm305_vm7, 1.0, %v697_v0 }
  0xa4   :  { %v301_v56 = vadd.f32 %v512_v52, %v294_v53  ;;  %v514_v58 = vsel %vm312_vm8, 1.0, %v697_v0 }
  0xa6   :  { %v308_v59 = vadd.f32 %v513_v57, %v301_v56  ;;  %v318_v60 = vpop.permute.xlu1 %317 }
  0xa7   :  { %vm319_vm9 = vcmp.eq.s32.totalorder %v114_v38, %v318_v60 }
  0xa8   :  { %v315_v61 = vadd.f32 %v514_v58, %v308_v59  ;;  %v515_v62 = vsel %vm319_vm9, 1.0, %v697_v0 }
  0xaa   :  { %v322_v63 = vadd.f32 %v515_v62, %v315_v61 }
  0xab   :  { %v325_v1 = vpop.permute.xlu1 %324 }
  0xac   :  { %vm326_vm10 = vcmp.eq.s32.totalorder %v114_v38, %v325_v1 }
  0xad   :  { %v516_v2 = vsel %vm326_vm10, 1.0, %v697_v0 }
  0xae   :  { %v329_v3 = vadd.f32 %v516_v2, %v322_v63 }
  0xb0   :  { %591 = vmatmul.mubr.f32.vlgmr.msra.gmra.mrb[0].mxu1 %v329_v3 }
  0xe9   :  { %v107_v41 = vpop.f32.mrb[0].mxu0 }
  0xea   :  { %v547_v42 = vpop.f32.mrb[1].mxu0  ;;  %549 = vmatpush3.msra.mxu0 %v107_v41  ;;  %v118_v43 = vadd.f32 %v506_v40, %v107_v41 }
  0xeb   :  { %551 = vmatmul.mubr.msk.f32.vlgmr.msra.gmra.mrb[2].mxu0 %vm37_vm1, %v107_v41  ;;  %553 = vmatprep.subr.mxu0 %v697_v0 }
  0xec   :  { %555 = vmatprep.mubr.msk.f32.mxu0 %vm698_vm0, %v697_v0 }
 0x183   :  { %v412_v7 = vpop.f32.mrb[0].mxu1 }
 0x184   :  { %v592_v8 = vpop.f32.mrb[1].mxu1 }
 0x1be   :  { %v188_v4 = vpop.f32.mrb[2].mxu0 }
 0x1bf   :  { %v192_v5 = vadd.f32 %v188_v4, %v118_v43  ;;  %v552_v6 = vpop.f32.mrb[3].mxu0  ;;  %554 = vmatpush3.msra.mxu0 %v188_v4 }
 0x1c0   :  { %556 = vmatmul.mubr.msk.f32.vlgmr.msra.gmra.mrb[4].mxu0 %vm37_vm1, %v107_v41  ;;  %593 = vmatprep.subr.mxu0 %v697_v0 }
 0x1c1   :  { %595 = vmatprep.mubr.msk.f32.mxu0 %vm698_vm0, %v697_v0  ;;  %594 = vmatpush3.msra.mxu0 %v412_v7 }
 0x293   :  { %v259_v13 = vpop.f32.mrb[4].mxu0 }
 0x294   :  { %v263_v14 = vadd.f32 %v259_v13, %v192_v5  ;;  %v557_v15 = vpop.f32.mrb[5].mxu0 }
 0x296   :  { %v272_v16 = vmul.f32 %v270_v12, %v263_v14 }
 0x298   :  { %596 = vmatmul.mubr.msk.f32.vlgmr.msra.gmra.mrb[6].mxu0 %vm37_vm1, %v272_v16 }
 0x36b   :  { %v485_v0 = vpop.f32.mrb[6].mxu0 }
 0x36c   :  { %489 = vst [vmem:[#allocation5] sm:$0xff] %v485_v0  ;;  %v597_v17 = vpop.f32.mrb[7].mxu0 }
 0x36d   :  { %679 = shalt.err (!%p676_p12)
}
 0x36e   :  { %s680_s15 = scalar_lea.hbm %s807_s5, 128 }
 0x36f   :  { %p681_p13 = scmp.ne.s32.totalorder %s807_s5, %s680_s15  ;;  %p684_p0 = scmp.lt.u32.totalorder %s680_s15, %s807_s5 }
 0x371   :  { %p686_p1 = pnand %p684_p0, %p681_p13 }
 0x373   :  { %689 = shalt.err (!%p686_p1)
}
 0x374   :  { %499 = dma.vmem_to_hbm [thread:$0]  %s497_s12, 128, %s807_s5, [#allocation4]  }
 0x375   :  { %692 = dma.done.wait [#allocation4], 128  }
 0x376   :  { %693 = vsyncadd [#allocation4], 4294967168 }
 0x377   :  { %503 = vsyncpa [#allocation3], 1 }
 0x378   :  { %504 = vsyncpa [#allocation4], 1 }

</bundles_post_ra>
